<compile_context>
chip_gen: v7x
topology: tpu7x:2x2x1
jax: 0.10.0
libtpu: 0.0.40
codegen_flags: <defaults>
</compile_context>

<pallas_src>
import functools
import math

import jax
import jax.numpy as jnp
from jax.experimental import pallas as pl
from jax.experimental.pallas import tpu as pltpu


# ----------------------------------------------------------------------------
# Pallas kernel
# ----------------------------------------------------------------------------
def _encoder_kernel(dropout_rate, training, eps, H, L2,
                    seed_ref,                     # scalar prefetch (SMEM)
                    x_ref,
                    w1_ref, w2_ref, w3_ref, w4_ref, w5_ref, wh_ref,
                    vec_ref,                      # packed (16, W) f32 vectors
                    out_ref):
    x = x_ref[...].astype(jnp.float32)

    # norm = x.pow(2).sum(-1).sqrt(); x = x / norm[:, None]   (rsqrt -> EUP)
    sumsq = jnp.sum(x * x, axis=-1, keepdims=True)
    x = x * jax.lax.rsqrt(sumsq)

    # F.dropout(x, p, training) — inverted dropout with per-call seed.
    # TODO(synk): in-kernel TPU PRNG cannot bit-match torch's RNG stream.
    if training and dropout_rate > 0.0:
        keep = 1.0 - float(dropout_rate)
        inv_keep = 1.0 / keep
        pltpu.prng_seed(seed_ref[0] + pl.program_id(0))
        bits = pltpu.bitcast(pltpu.prng_random_bits(x.shape), jnp.uint32)
        u = (bits >> 8).astype(jnp.float32) * (1.0 / float(1 << 24))  # [0, 1)
        mask = jnp.where(u < keep, inv_keep, 0.0)   # scale folded into mask
        x = x * mask

    # Packed small vectors: rows 0-4 biases, 5-9 LN gammas, 10-14 LN betas,
    # row 15 fused head bias. Column widths are compile-time constants.
    vec = vec_ref[...]
    def bias(i):  return vec[i:i + 1, 0:H]
    def gamma(i): return vec[5 + i:6 + i, 0:H]
    def beta(i):  return vec[10 + i:11 + i, 0:H]
    b_head = vec[15:16, 0:L2]

    def layer_norm(h, g, be):
        mean = jnp.mean(h, axis=-1, keepdims=True)
        var = jnp.mean(h * h, axis=-1, keepdims=True) - mean * mean  # 1-pass
        return (h - mean) * jax.lax.rsqrt(var + eps) * g + be

    def block(h_in, residual, w_ref, idx):
        w = w_ref[...].astype(jnp.float32)          # bf16 -> f32 in VMEM
        z = jnp.dot(h_in, w, preferred_element_type=jnp.float32) + bias(idx)
        if residual is not None:
            z = z + residual
        h = z * jax.nn.sigmoid(z)                   # swish
        return layer_norm(h, gamma(idx), beta(idx))

    h1 = block(x, None, w1_ref, 0)
    s = h1                                          # running residual sum
    h2 = block(h1, s, w2_ref, 1); s = s + h2
    h3 = block(h2, s, w3_ref, 2); s = s + h3
    h4 = block(h3, s, w4_ref, 3); s = s + h4
    h5 = block(h4, s, w5_ref, 4)

    # Fused mu|logvar head: one 128-wide matmul, one lane-dense store.
    wh = wh_ref[...].astype(jnp.float32)
    out = jnp.dot(h5, wh, preferred_element_type=jnp.float32) + b_head
    out_ref[...] = out.astype(out_ref.dtype)


# ----------------------------------------------------------------------------
# Wrapper
# ----------------------------------------------------------------------------
def encoder_forward(x, params, dropout_rate, training=False, eps=0.1, seed=0):
    batch, input_dim = x.shape
    H = params["w1"].shape[1]
    L = params["w_mu"].shape[1]
    L2 = 2 * L
    W = max(H, L2)

    # Fuse the two output heads.
    w_head = jnp.concatenate([params["w_mu"], params["w_lv"]], axis=1)   # (H, 2L)
    b_head = jnp.concatenate([params["b_mu"], params["b_lv"]], axis=1)   # (1, 2L)

    # Pack all tiny per-layer vectors into a single (16, W) f32 array.
    def pad_cols(v):
        return jnp.pad(v, ((0, 0), (0, W - v.shape[1])))
    rows = [pad_cols(params[f"b{i}"]) for i in range(1, 6)]
    rows += [pad_cols(params[f"g{i}"]) for i in range(1, 6)]
    rows += [pad_cols(params[f"be{i}"]) for i in range(1, 6)]
    rows += [pad_cols(b_head)]
    vec_pack = jnp.concatenate(rows, axis=0).astype(jnp.float32)         # (16, W)

    # Ship weight matrices as bf16 (halves weight DMA); f32 math in-kernel.
    w_bf16 = [params[f"w{i}"].astype(jnp.bfloat16) for i in range(1, 6)]
    wh_bf16 = w_head.astype(jnp.bfloat16)

    # 1-D grid over batch (single block at toy sizes); weights stay resident.
    bb = batch if batch <= 128 else 128
    grid = (pl.cdiv(batch, bb),)

    seed_arr = jnp.asarray([seed], jnp.int32)

    kernel = functools.partial(_encoder_kernel, float(dropout_rate),
                               bool(training), float(eps), H, L2)

    out = pl.pallas_call(
        kernel,
        out_shape=jax.ShapeDtypeStruct((batch, L2), jnp.float32),
        grid_spec=pltpu.PrefetchScalarGridSpec(
            num_scalar_prefetch=1,
            grid=grid,
            in_specs=[
                pl.BlockSpec((bb, input_dim), lambda i, s: (i, 0)),      # x
                pl.BlockSpec((input_dim, H), lambda i, s: (0, 0)),       # w1
                pl.BlockSpec((H, H), lambda i, s: (0, 0)),               # w2
                pl.BlockSpec((H, H), lambda i, s: (0, 0)),               # w3
                pl.BlockSpec((H, H), lambda i, s: (0, 0)),               # w4
                pl.BlockSpec((H, H), lambda i, s: (0, 0)),               # w5
                pl.BlockSpec((H, L2), lambda i, s: (0, 0)),              # w_head
                pl.BlockSpec((16, W), lambda i, s: (0, 0)),              # vec pack
            ],
            out_specs=pl.BlockSpec((bb, L2), lambda i, s: (i, 0)),
        ),
        compiler_params=pltpu.CompilerParams(
            dimension_semantics=("parallel",),
        ),
    )(seed_arr, x.astype(jnp.float32), *w_bf16, wh_bf16, vec_pack)

    mu = out[:, :L]
    logvar = out[:, L:]
    return mu, logvar


# ----------------------------------------------------------------------------
# Deterministic parameter init (same fan-in uniform scheme as torch.nn.Linear)
# ----------------------------------------------------------------------------
def init_params(key, input_dim, hidden_dim, latent_dim):
    def linear_init(k, fan_in, fan_out):
        kw, kb = jax.random.split(k)
        bound = 1.0 / math.sqrt(fan_in)
        w = jax.random.uniform(kw, (fan_in, fan_out), jnp.float32, -bound, bound)
        b = jax.random.uniform(kb, (1, fan_out), jnp.float32, -bound, bound)
        return w, b

    keys = jax.random.split(key, 7)
    params = {}
    dims_in = [input_dim] + [hidden_dim] * 4
    for i in range(5):
        w, b = linear_init(keys[i], dims_in[i], hidden_dim)
        params[f"w{i+1}"] = w
        params[f"b{i+1}"] = b
        params[f"g{i+1}"] = jnp.ones((1, hidden_dim), jnp.float32)    # LN gamma
        params[f"be{i+1}"] = jnp.zeros((1, hidden_dim), jnp.float32)  # LN beta
    params["w_mu"], params["b_mu"] = linear_init(keys[5], hidden_dim, latent_dim)
    params["w_lv"], params["b_lv"] = linear_init(keys[6], hidden_dim, latent_dim)
    return params


# ----------------------------------------------------------------------------
# Pure-JAX reference (eval mode / no dropout) for correctness check
# ----------------------------------------------------------------------------
def encoder_reference(x, params, eps=0.1):
    def linear(h, w, b):
        return h @ w + b

    def swish(h):
        return h * jax.nn.sigmoid(h)

    def layer_norm(h, g, be):
        mean = jnp.mean(h, axis=-1, keepdims=True)
        var = jnp.mean((h - mean) ** 2, axis=-1, keepdims=True)
        return (h - mean) / jnp.sqrt(var + eps) * g + be

    x = x / jnp.sqrt(jnp.sum(x * x, axis=-1, keepdims=True))
    h1 = layer_norm(swish(linear(x, params["w1"], params["b1"])), params["g1"], params["be1"])
    h2 = layer_norm(swish(linear(h1, params["w2"], params["b2"]) + h1), params["g2"], params["be2"])
    h3 = layer_norm(swish(linear(h2, params["w3"], params["b3"]) + h1 + h2), params["g3"], params["be3"])
    h4 = layer_norm(swish(linear(h3, params["w4"], params["b4"]) + h1 + h2 + h3), params["g4"], params["be4"])
    h5 = layer_norm(swish(linear(h4, params["w5"], params["b5"]) + h1 + h2 + h3 + h4), params["g5"], params["be5"])
    return linear(h5, params["w_mu"], params["b_mu"]), linear(h5, params["w_lv"], params["b_lv"])


if __name__ == "__main__":
    batch, input_dim, hidden_dim, latent_dim = 8, 256, 128, 64

    key = jax.random.PRNGKey(0)
    kx, kp = jax.random.split(key)
    # Implicit-feedback style non-negative input (RecVAE operates on item counts).
    x = jax.random.uniform(kx, (batch, input_dim), jnp.float32, 0.0, 1.0) + 1e-3
    params = init_params(kp, input_dim, hidden_dim, latent_dim)

    mu, logvar = encoder_forward(x, params, dropout_rate=0.5, training=False, eps=0.1)
    jax.block_until_ready((mu, logvar))

    # The kernel consumes bf16-stored weights; compare against a reference that
    # uses the identical (bf16-rounded) weight values, all math in f32.
    params_q = dict(params)
    for name in ["w1", "w2", "w3", "w4", "w5", "w_mu", "w_lv"]:
        params_q[name] = params[name].astype(jnp.bfloat16).astype(jnp.float32)
    mu_ref, lv_ref = encoder_reference(x, params_q, eps=0.1)

    assert mu.shape == (batch, latent_dim) and logvar.shape == (batch, latent_dim)
    assert jnp.allclose(mu, mu_ref, atol=1e-4, rtol=1e-4)
    assert jnp.allclose(logvar, lv_ref, atol=1e-4, rtol=1e-4)

    print("KERNEL_OK")
</pallas_src>

<mosaic_0001>
module attributes {stable_mosaic.version = 11 : i64} {
  func.func @_encoder_kernel(%arg0: i32, %arg1: memref<1xi32, #tpu.memory_space<smem>>, %arg2: memref<8x256xf32, #tpu.memory_space<vmem>>, %arg3: memref<256x128xbf16, #tpu.memory_space<vmem>>, %arg4: memref<128x128xbf16, #tpu.memory_space<vmem>>, %arg5: memref<128x128xbf16, #tpu.memory_space<vmem>>, %arg6: memref<128x128xbf16, #tpu.memory_space<vmem>>, %arg7: memref<128x128xbf16, #tpu.memory_space<vmem>>, %arg8: memref<128x128xbf16, #tpu.memory_space<vmem>>, %arg9: memref<16x128xf32, #tpu.memory_space<vmem>>, %arg10: memref<8x128xf32, #tpu.memory_space<vmem>>) attributes {dimension_semantics = [#tpu.dimension_semantics<parallel>], iteration_bounds = array<i64: 1>, scalar_prefetch = 1 : i64, scratch_operands = 0 : i64, tpu.core_type = #tpu.core_type<tc>, window_params = [{transform_indices = @transform_0, window_bounds = array<i64: 8, 256>}, {pipeline_mode = #tpu.pipeline_mode<synchronous>, transform_indices = @transform_1, window_bounds = array<i64: 256, 128>}, {pipeline_mode = #tpu.pipeline_mode<synchronous>, transform_indices = @transform_2, window_bounds = array<i64: 128, 128>}, {pipeline_mode = #tpu.pipeline_mode<synchronous>, transform_indices = @transform_3, window_bounds = array<i64: 128, 128>}, {pipeline_mode = #tpu.pipeline_mode<synchronous>, transform_indices = @transform_4, window_bounds = array<i64: 128, 128>}, {pipeline_mode = #tpu.pipeline_mode<synchronous>, transform_indices = @transform_5, window_bounds = array<i64: 128, 128>}, {pipeline_mode = #tpu.pipeline_mode<synchronous>, transform_indices = @transform_6, window_bounds = array<i64: 128, 128>}, {pipeline_mode = #tpu.pipeline_mode<synchronous>, transform_indices = @transform_7, window_bounds = array<i64: 16, 128>}, {transform_indices = @transform_8, window_bounds = array<i64: 8, 128>}]} {
    %c0 = arith.constant 0 : index
    %c0_0 = arith.constant 0 : index
    %0 = vector.load %arg2[%c0, %c0_0] : memref<8x256xf32, #tpu.memory_space<vmem>>, vector<8x256xf32>
    %1 = arith.mulf %0, %0 : vector<8x256xf32>
    %cst = arith.constant dense<0.000000e+00> : vector<8xf32>
    %2 = vector.multi_reduction <add>, %1, %cst [1] : vector<8x256xf32> to vector<8xf32>
    %3 = vector.shape_cast %2 : vector<8xf32> to vector<8x1xf32>
    %4 = math.rsqrt %3 : vector<8x1xf32>
    %5 = vector.broadcast %4 : vector<8x1xf32> to vector<8x256xf32>
    %6 = arith.mulf %0, %5 : vector<8x256xf32>
    %c0_1 = arith.constant 0 : index
    %c0_2 = arith.constant 0 : index
    %7 = vector.load %arg9[%c0_1, %c0_2] : memref<16x128xf32, #tpu.memory_space<vmem>>, vector<16x128xf32>
    %8 = vector.extract_strided_slice %7 {offsets = [15, 0], sizes = [1, 128], strides = [1, 1]} : vector<16x128xf32> to vector<1x128xf32>
    %c0_3 = arith.constant 0 : index
    %c0_4 = arith.constant 0 : index
    %9 = vector.load %arg3[%c0_3, %c0_4] : memref<256x128xbf16, #tpu.memory_space<vmem>>, vector<256x128xbf16>
    %10 = arith.extf %9 : vector<256x128xbf16> to vector<256x128xf32>
    %cst_5 = arith.constant dense<0.000000e+00> : vector<8x128xf32>
    %11 = tpu.matmul %6, %10, %cst_5 {dimension_numbers = #tpu.dot_dimension_numbers<[1], [0], [0], [1], [0, 0, 1, 1], [], []>} : vector<8x256xf32>, vector<256x128xf32>, vector<8x128xf32> -> vector<8x128xf32>
    %12 = vector.extract_strided_slice %7 {offsets = [0, 0], sizes = [1, 128], strides = [1, 1]} : vector<16x128xf32> to vector<1x128xf32>
    %13 = vector.broadcast %12 : vector<1x128xf32> to vector<8x128xf32>
    %14 = arith.addf %11, %13 : vector<8x128xf32>
    %15 = arith.negf %14 : vector<8x128xf32>
    %16 = math.exp %15 : vector<8x128xf32>
    %cst_6 = arith.constant 1.000000e+00 : f32
    %17 = vector.broadcast %cst_6 : f32 to vector<8x128xf32>
    %18 = arith.addf %17, %16 : vector<8x128xf32>
    %19 = arith.divf %17, %18 : vector<8x128xf32>
    %20 = arith.mulf %14, %19 : vector<8x128xf32>
    %21 = vector.extract_strided_slice %7 {offsets = [5, 0], sizes = [1, 128], strides = [1, 1]} : vector<16x128xf32> to vector<1x128xf32>
    %22 = vector.extract_strided_slice %7 {offsets = [10, 0], sizes = [1, 128], strides = [1, 1]} : vector<16x128xf32> to vector<1x128xf32>
    %cst_7 = arith.constant dense<0.000000e+00> : vector<8xf32>
    %23 = vector.multi_reduction <add>, %20, %cst_7 [1] : vector<8x128xf32> to vector<8xf32>
    %24 = vector.shape_cast %23 : vector<8xf32> to vector<8x1xf32>
    %cst_8 = arith.constant 1.280000e+02 : f32
    %25 = vector.broadcast %cst_8 : f32 to vector<8x1xf32>
    %26 = arith.divf %24, %25 : vector<8x1xf32>
    %27 = arith.mulf %20, %20 : vector<8x128xf32>
    %cst_9 = arith.constant dense<0.000000e+00> : vector<8xf32>
    %28 = vector.multi_reduction <add>, %27, %cst_9 [1] : vector<8x128xf32> to vector<8xf32>
    %29 = vector.shape_cast %28 : vector<8xf32> to vector<8x1xf32>
    %cst_10 = arith.constant 1.280000e+02 : f32
    %30 = vector.broadcast %cst_10 : f32 to vector<8x1xf32>
    %31 = arith.divf %29, %30 : vector<8x1xf32>
    %32 = arith.mulf %26, %26 : vector<8x1xf32>
    %33 = arith.subf %31, %32 : vector<8x1xf32>
    %34 = vector.broadcast %26 : vector<8x1xf32> to vector<8x128xf32>
    %35 = arith.subf %20, %34 : vector<8x128xf32>
    %cst_11 = arith.constant 1.000000e-01 : f32
    %36 = vector.broadcast %cst_11 : f32 to vector<8x1xf32>
    %37 = arith.addf %33, %36 : vector<8x1xf32>
    %38 = math.rsqrt %37 : vector<8x1xf32>
    %39 = vector.broadcast %38 : vector<8x1xf32> to vector<8x128xf32>
    %40 = arith.mulf %35, %39 : vector<8x128xf32>
    %41 = vector.broadcast %21 : vector<1x128xf32> to vector<8x128xf32>
    %42 = arith.mulf %40, %41 : vector<8x128xf32>
    %43 = vector.broadcast %22 : vector<1x128xf32> to vector<8x128xf32>
    %44 = arith.addf %42, %43 : vector<8x128xf32>
    %c0_12 = arith.constant 0 : index
    %c0_13 = arith.constant 0 : index
    %45 = vector.load %arg4[%c0_12, %c0_13] : memref<128x128xbf16, #tpu.memory_space<vmem>>, vector<128x128xbf16>
    %46 = arith.extf %45 : vector<128x128xbf16> to vector<128x128xf32>
    %cst_14 = arith.constant dense<0.000000e+00> : vector<8x128xf32>
    %47 = tpu.matmul %44, %46, %cst_14 {dimension_numbers = #tpu.dot_dimension_numbers<[1], [0], [0], [1], [0, 0, 1, 1], [], []>} : vector<8x128xf32>, vector<128x128xf32>, vector<8x128xf32> -> vector<8x128xf32>
    %48 = vector.extract_strided_slice %7 {offsets = [1, 0], sizes = [1, 128], strides = [1, 1]} : vector<16x128xf32> to vector<1x128xf32>
    %49 = vector.broadcast %48 : vector<1x128xf32> to vector<8x128xf32>
    %50 = arith.addf %47, %49 : vector<8x128xf32>
    %51 = arith.addf %50, %44 : vector<8x128xf32>
    %52 = arith.negf %51 : vector<8x128xf32>
    %53 = math.exp %52 : vector<8x128xf32>
    %cst_15 = arith.constant 1.000000e+00 : f32
    %54 = vector.broadcast %cst_15 : f32 to vector<8x128xf32>
    %55 = arith.addf %54, %53 : vector<8x128xf32>
    %56 = arith.divf %54, %55 : vector<8x128xf32>
    %57 = arith.mulf %51, %56 : vector<8x128xf32>
    %58 = vector.extract_strided_slice %7 {offsets = [6, 0], sizes = [1, 128], strides = [1, 1]} : vector<16x128xf32> to vector<1x128xf32>
    %59 = vector.extract_strided_slice %7 {offsets = [11, 0], sizes = [1, 128], strides = [1, 1]} : vector<16x128xf32> to vector<1x128xf32>
    %cst_16 = arith.constant dense<0.000000e+00> : vector<8xf32>
    %60 = vector.multi_reduction <add>, %57, %cst_16 [1] : vector<8x128xf32> to vector<8xf32>
    %61 = vector.shape_cast %60 : vector<8xf32> to vector<8x1xf32>
    %cst_17 = arith.constant 1.280000e+02 : f32
    %62 = vector.broadcast %cst_17 : f32 to vector<8x1xf32>
    %63 = arith.divf %61, %62 : vector<8x1xf32>
    %64 = arith.mulf %57, %57 : vector<8x128xf32>
    %cst_18 = arith.constant dense<0.000000e+00> : vector<8xf32>
    %65 = vector.multi_reduction <add>, %64, %cst_18 [1] : vector<8x128xf32> to vector<8xf32>
    %66 = vector.shape_cast %65 : vector<8xf32> to vector<8x1xf32>
    %cst_19 = arith.constant 1.280000e+02 : f32
    %67 = vector.broadcast %cst_19 : f32 to vector<8x1xf32>
    %68 = arith.divf %66, %67 : vector<8x1xf32>
    %69 = arith.mulf %63, %63 : vector<8x1xf32>
    %70 = arith.subf %68, %69 : vector<8x1xf32>
    %71 = vector.broadcast %63 : vector<8x1xf32> to vector<8x128xf32>
    %72 = arith.subf %57, %71 : vector<8x128xf32>
    %cst_20 = arith.constant 1.000000e-01 : f32
    %73 = vector.broadcast %cst_20 : f32 to vector<8x1xf32>
    %74 = arith.addf %70, %73 : vector<8x1xf32>
    %75 = math.rsqrt %74 : vector<8x1xf32>
    %76 = vector.broadcast %75 : vector<8x1xf32> to vector<8x128xf32>
    %77 = arith.mulf %72, %76 : vector<8x128xf32>
    %78 = vector.broadcast %58 : vector<1x128xf32> to vector<8x128xf32>
    %79 = arith.mulf %77, %78 : vector<8x128xf32>
    %80 = vector.broadcast %59 : vector<1x128xf32> to vector<8x128xf32>
    %81 = arith.addf %79, %80 : vector<8x128xf32>
    %82 = arith.addf %44, %81 : vector<8x128xf32>
    %c0_21 = arith.constant 0 : index
    %c0_22 = arith.constant 0 : index
    %83 = vector.load %arg5[%c0_21, %c0_22] : memref<128x128xbf16, #tpu.memory_space<vmem>>, vector<128x128xbf16>
    %84 = arith.extf %83 : vector<128x128xbf16> to vector<128x128xf32>
    %cst_23 = arith.constant dense<0.000000e+00> : vector<8x128xf32>
    %85 = tpu.matmul %81, %84, %cst_23 {dimension_numbers = #tpu.dot_dimension_numbers<[1], [0], [0], [1], [0, 0, 1, 1], [], []>} : vector<8x128xf32>, vector<128x128xf32>, vector<8x128xf32> -> vector<8x128xf32>
    %86 = vector.extract_strided_slice %7 {offsets = [2, 0], sizes = [1, 128], strides = [1, 1]} : vector<16x128xf32> to vector<1x128xf32>
    %87 = vector.broadcast %86 : vector<1x128xf32> to vector<8x128xf32>
    %88 = arith.addf %85, %87 : vector<8x128xf32>
    %89 = arith.addf %88, %82 : vector<8x128xf32>
    %90 = arith.negf %89 : vector<8x128xf32>
    %91 = math.exp %90 : vector<8x128xf32>
    %cst_24 = arith.constant 1.000000e+00 : f32
    %92 = vector.broadcast %cst_24 : f32 to vector<8x128xf32>
    %93 = arith.addf %92, %91 : vector<8x128xf32>
    %94 = arith.divf %92, %93 : vector<8x128xf32>
    %95 = arith.mulf %89, %94 : vector<8x128xf32>
    %96 = vector.extract_strided_slice %7 {offsets = [7, 0], sizes = [1, 128], strides = [1, 1]} : vector<16x128xf32> to vector<1x128xf32>
    %97 = vector.extract_strided_slice %7 {offsets = [12, 0], sizes = [1, 128], strides = [1, 1]} : vector<16x128xf32> to vector<1x128xf32>
    %cst_25 = arith.constant dense<0.000000e+00> : vector<8xf32>
    %98 = vector.multi_reduction <add>, %95, %cst_25 [1] : vector<8x128xf32> to vector<8xf32>
    %99 = vector.shape_cast %98 : vector<8xf32> to vector<8x1xf32>
    %cst_26 = arith.constant 1.280000e+02 : f32
    %100 = vector.broadcast %cst_26 : f32 to vector<8x1xf32>
    %101 = arith.divf %99, %100 : vector<8x1xf32>
    %102 = arith.mulf %95, %95 : vector<8x128xf32>
    %cst_27 = arith.constant dense<0.000000e+00> : vector<8xf32>
    %103 = vector.multi_reduction <add>, %102, %cst_27 [1] : vector<8x128xf32> to vector<8xf32>
    %104 = vector.shape_cast %103 : vector<8xf32> to vector<8x1xf32>
    %cst_28 = arith.constant 1.280000e+02 : f32
    %105 = vector.broadcast %cst_28 : f32 to vector<8x1xf32>
    %106 = arith.divf %104, %105 : vector<8x1xf32>
    %107 = arith.mulf %101, %101 : vector<8x1xf32>
    %108 = arith.subf %106, %107 : vector<8x1xf32>
    %109 = vector.broadcast %101 : vector<8x1xf32> to vector<8x128xf32>
    %110 = arith.subf %95, %109 : vector<8x128xf32>
    %cst_29 = arith.constant 1.000000e-01 : f32
    %111 = vector.broadcast %cst_29 : f32 to vector<8x1xf32>
    %112 = arith.addf %108, %111 : vector<8x1xf32>
    %113 = math.rsqrt %112 : vector<8x1xf32>
    %114 = vector.broadcast %113 : vector<8x1xf32> to vector<8x128xf32>
    %115 = arith.mulf %110, %114 : vector<8x128xf32>
    %116 = vector.broadcast %96 : vector<1x128xf32> to vector<8x128xf32>
    %117 = arith.mulf %115, %116 : vector<8x128xf32>
    %118 = vector.broadcast %97 : vector<1x128xf32> to vector<8x128xf32>
    %119 = arith.addf %117, %118 : vector<8x128xf32>
    %120 = arith.addf %82, %119 : vector<8x128xf32>
    %c0_30 = arith.constant 0 : index
    %c0_31 = arith.constant 0 : index
    %121 = vector.load %arg6[%c0_30, %c0_31] : memref<128x128xbf16, #tpu.memory_space<vmem>>, vector<128x128xbf16>
    %122 = arith.extf %121 : vector<128x128xbf16> to vector<128x128xf32>
    %cst_32 = arith.constant dense<0.000000e+00> : vector<8x128xf32>
    %123 = tpu.matmul %119, %122, %cst_32 {dimension_numbers = #tpu.dot_dimension_numbers<[1], [0], [0], [1], [0, 0, 1, 1], [], []>} : vector<8x128xf32>, vector<128x128xf32>, vector<8x128xf32> -> vector<8x128xf32>
    %124 = vector.extract_strided_slice %7 {offsets = [3, 0], sizes = [1, 128], strides = [1, 1]} : vector<16x128xf32> to vector<1x128xf32>
    %125 = vector.broadcast %124 : vector<1x128xf32> to vector<8x128xf32>
    %126 = arith.addf %123, %125 : vector<8x128xf32>
    %127 = arith.addf %126, %120 : vector<8x128xf32>
    %128 = arith.negf %127 : vector<8x128xf32>
    %129 = math.exp %128 : vector<8x128xf32>
    %cst_33 = arith.constant 1.000000e+00 : f32
    %130 = vector.broadcast %cst_33 : f32 to vector<8x128xf32>
    %131 = arith.addf %130, %129 : vector<8x128xf32>
    %132 = arith.divf %130, %131 : vector<8x128xf32>
    %133 = arith.mulf %127, %132 : vector<8x128xf32>
    %134 = vector.extract_strided_slice %7 {offsets = [8, 0], sizes = [1, 128], strides = [1, 1]} : vector<16x128xf32> to vector<1x128xf32>
    %135 = vector.extract_strided_slice %7 {offsets = [13, 0], sizes = [1, 128], strides = [1, 1]} : vector<16x128xf32> to vector<1x128xf32>
    %cst_34 = arith.constant dense<0.000000e+00> : vector<8xf32>
    %136 = vector.multi_reduction <add>, %133, %cst_34 [1] : vector<8x128xf32> to vector<8xf32>
    %137 = vector.shape_cast %136 : vector<8xf32> to vector<8x1xf32>
    %cst_35 = arith.constant 1.280000e+02 : f32
    %138 = vector.broadcast %cst_35 : f32 to vector<8x1xf32>
    %139 = arith.divf %137, %138 : vector<8x1xf32>
    %140 = arith.mulf %133, %133 : vector<8x128xf32>
    %cst_36 = arith.constant dense<0.000000e+00> : vector<8xf32>
    %141 = vector.multi_reduction <add>, %140, %cst_36 [1] : vector<8x128xf32> to vector<8xf32>
    %142 = vector.shape_cast %141 : vector<8xf32> to vector<8x1xf32>
    %cst_37 = arith.constant 1.280000e+02 : f32
    %143 = vector.broadcast %cst_37 : f32 to vector<8x1xf32>
    %144 = arith.divf %142, %143 : vector<8x1xf32>
    %145 = arith.mulf %139, %139 : vector<8x1xf32>
    %146 = arith.subf %144, %145 : vector<8x1xf32>
    %147 = vector.broadcast %139 : vector<8x1xf32> to vector<8x128xf32>
    %148 = arith.subf %133, %147 : vector<8x128xf32>
    %cst_38 = arith.constant 1.000000e-01 : f32
    %149 = vector.broadcast %cst_38 : f32 to vector<8x1xf32>
    %150 = arith.addf %146, %149 : vector<8x1xf32>
    %151 = math.rsqrt %150 : vector<8x1xf32>
    %152 = vector.broadcast %151 : vector<8x1xf32> to vector<8x128xf32>
    %153 = arith.mulf %148, %152 : vector<8x128xf32>
    %154 = vector.broadcast %134 : vector<1x128xf32> to vector<8x128xf32>
    %155 = arith.mulf %153, %154 : vector<8x128xf32>
    %156 = vector.broadcast %135 : vector<1x128xf32> to vector<8x128xf32>
    %157 = arith.addf %155, %156 : vector<8x128xf32>
    %158 = arith.addf %120, %157 : vector<8x128xf32>
    %c0_39 = arith.constant 0 : index
    %c0_40 = arith.constant 0 : index
    %159 = vector.load %arg7[%c0_39, %c0_40] : memref<128x128xbf16, #tpu.memory_space<vmem>>, vector<128x128xbf16>
    %160 = arith.extf %159 : vector<128x128xbf16> to vector<128x128xf32>
    %cst_41 = arith.constant dense<0.000000e+00> : vector<8x128xf32>
    %161 = tpu.matmul %157, %160, %cst_41 {dimension_numbers = #tpu.dot_dimension_numbers<[1], [0], [0], [1], [0, 0, 1, 1], [], []>} : vector<8x128xf32>, vector<128x128xf32>, vector<8x128xf32> -> vector<8x128xf32>
    %162 = vector.extract_strided_slice %7 {offsets = [4, 0], sizes = [1, 128], strides = [1, 1]} : vector<16x128xf32> to vector<1x128xf32>
    %163 = vector.broadcast %162 : vector<1x128xf32> to vector<8x128xf32>
    %164 = arith.addf %161, %163 : vector<8x128xf32>
    %165 = arith.addf %164, %158 : vector<8x128xf32>
    %166 = arith.negf %165 : vector<8x128xf32>
    %167 = math.exp %166 : vector<8x128xf32>
    %cst_42 = arith.constant 1.000000e+00 : f32
    %168 = vector.broadcast %cst_42 : f32 to vector<8x128xf32>
    %169 = arith.addf %168, %167 : vector<8x128xf32>
    %170 = arith.divf %168, %169 : vector<8x128xf32>
    %171 = arith.mulf %165, %170 : vector<8x128xf32>
    %172 = vector.extract_strided_slice %7 {offsets = [9, 0], sizes = [1, 128], strides = [1, 1]} : vector<16x128xf32> to vector<1x128xf32>
    %173 = vector.extract_strided_slice %7 {offsets = [14, 0], sizes = [1, 128], strides = [1, 1]} : vector<16x128xf32> to vector<1x128xf32>
    %cst_43 = arith.constant dense<0.000000e+00> : vector<8xf32>
    %174 = vector.multi_reduction <add>, %171, %cst_43 [1] : vector<8x128xf32> to vector<8xf32>
    %175 = vector.shape_cast %174 : vector<8xf32> to vector<8x1xf32>
    %cst_44 = arith.constant 1.280000e+02 : f32
    %176 = vector.broadcast %cst_44 : f32 to vector<8x1xf32>
    %177 = arith.divf %175, %176 : vector<8x1xf32>
    %178 = arith.mulf %171, %171 : vector<8x128xf32>
    %cst_45 = arith.constant dense<0.000000e+00> : vector<8xf32>
    %179 = vector.multi_reduction <add>, %178, %cst_45 [1] : vector<8x128xf32> to vector<8xf32>
    %180 = vector.shape_cast %179 : vector<8xf32> to vector<8x1xf32>
    %cst_46 = arith.constant 1.280000e+02 : f32
    %181 = vector.broadcast %cst_46 : f32 to vector<8x1xf32>
    %182 = arith.divf %180, %181 : vector<8x1xf32>
    %183 = arith.mulf %177, %177 : vector<8x1xf32>
    %184 = arith.subf %182, %183 : vector<8x1xf32>
    %185 = vector.broadcast %177 : vector<8x1xf32> to vector<8x128xf32>
    %186 = arith.subf %171, %185 : vector<8x128xf32>
    %cst_47 = arith.constant 1.000000e-01 : f32
    %187 = vector.broadcast %cst_47 : f32 to vector<8x1xf32>
    %188 = arith.addf %184, %187 : vector<8x1xf32>
    %189 = math.rsqrt %188 : vector<8x1xf32>
    %190 = vector.broadcast %189 : vector<8x1xf32> to vector<8x128xf32>
    %191 = arith.mulf %186, %190 : vector<8x128xf32>
    %192 = vector.broadcast %172 : vector<1x128xf32> to vector<8x128xf32>
    %193 = arith.mulf %191, %192 : vector<8x128xf32>
    %194 = vector.broadcast %173 : vector<1x128xf32> to vector<8x128xf32>
    %195 = arith.addf %193, %194 : vector<8x128xf32>
    %c0_48 = arith.constant 0 : index
    %c0_49 = arith.constant 0 : index
    %196 = vector.load %arg8[%c0_48, %c0_49] : memref<128x128xbf16, #tpu.memory_space<vmem>>, vector<128x128xbf16>
    %197 = arith.extf %196 : vector<128x128xbf16> to vector<128x128xf32>
    %cst_50 = arith.constant dense<0.000000e+00> : vector<8x128xf32>
    %198 = tpu.matmul %195, %197, %cst_50 {dimension_numbers = #tpu.dot_dimension_numbers<[1], [0], [0], [1], [0, 0, 1, 1], [], []>} : vector<8x128xf32>, vector<128x128xf32>, vector<8x128xf32> -> vector<8x128xf32>
    %199 = vector.broadcast %8 : vector<1x128xf32> to vector<8x128xf32>
    %200 = arith.addf %198, %199 : vector<8x128xf32>
    %c0_51 = arith.constant 0 : index
    %c0_52 = arith.constant 0 : index
    %201 = vector.load %arg10[%c0_51, %c0_52] : memref<8x128xf32, #tpu.memory_space<vmem>>, vector<8x128xf32>
    tpu.vector_store %arg10[%c0_51, %c0_52], %200 {strides = array<i32>} : memref<8x128xf32, #tpu.memory_space<vmem>>, vector<8x128xf32>,
    return
  }
  func.func @transform_0(%arg0: i32, %arg1: memref<1xi32, #tpu.memory_space<smem>>) -> (i32, i32) {
    %c0_i32 = arith.constant 0 : i32
    %c0_i32_0 = arith.constant 0 : i32
    return %arg0, %c0_i32 : i32, i32
  }
  func.func @transform_1(%arg0: i32, %arg1: memref<1xi32, #tpu.memory_space<smem>>) -> (i32, i32) {
    %c0_i32 = arith.constant 0 : i32
    %c0_i32_0 = arith.constant 0 : i32
    %c0_i32_1 = arith.constant 0 : i32
    return %c0_i32, %c0_i32_0 : i32, i32
  }
  func.func @transform_2(%arg0: i32, %arg1: memref<1xi32, #tpu.memory_space<smem>>) -> (i32, i32) {
    %c0_i32 = arith.constant 0 : i32
    %c0_i32_0 = arith.constant 0 : i32
    %c0_i32_1 = arith.constant 0 : i32
    return %c0_i32, %c0_i32_0 : i32, i32
  }
  func.func @transform_3(%arg0: i32, %arg1: memref<1xi32, #tpu.memory_space<smem>>) -> (i32, i32) {
    %c0_i32 = arith.constant 0 : i32
    %c0_i32_0 = arith.constant 0 : i32
    %c0_i32_1 = arith.constant 0 : i32
    return %c0_i32, %c0_i32_0 : i32, i32
  }
  func.func @transform_4(%arg0: i32, %arg1: memref<1xi32, #tpu.memory_space<smem>>) -> (i32, i32) {
    %c0_i32 = arith.constant 0 : i32
    %c0_i32_0 = arith.constant 0 : i32
    %c0_i32_1 = arith.constant 0 : i32
    return %c0_i32, %c0_i32_0 : i32, i32
  }
  func.func @transform_5(%arg0: i32, %arg1: memref<1xi32, #tpu.memory_space<smem>>) -> (i32, i32) {
    %c0_i32 = arith.constant 0 : i32
    %c0_i32_0 = arith.constant 0 : i32
    %c0_i32_1 = arith.constant 0 : i32
    return %c0_i32, %c0_i32_0 : i32, i32
  }
  func.func @transform_6(%arg0: i32, %arg1: memref<1xi32, #tpu.memory_space<smem>>) -> (i32, i32) {
    %c0_i32 = arith.constant 0 : i32
    %c0_i32_0 = arith.constant 0 : i32
    %c0_i32_1 = arith.constant 0 : i32
    return %c0_i32, %c0_i32_0 : i32, i32
  }
  func.func @transform_7(%arg0: i32, %arg1: memref<1xi32, #tpu.memory_space<smem>>) -> (i32, i32) {
    %c0_i32 = arith.constant 0 : i32
    %c0_i32_0 = arith.constant 0 : i32
    %c0_i32_1 = arith.constant 0 : i32
    return %c0_i32, %c0_i32_0 : i32, i32
  }
  func.func @transform_8(%arg0: i32, %arg1: memref<1xi32, #tpu.memory_space<smem>>) -> (i32, i32) {
    %c0_i32 = arith.constant 0 : i32
    %c0_i32_0 = arith.constant 0 : i32
    return %arg0, %c0_i32 : i32, i32
  }
}

</mosaic_0001>

<bundles_post_ra>
// kernel: tpu_custom_call.1
= control target key start
LH: loop header
LB: loop body
LE: loop exit
PB: predicated region body
PF: predicated region fallthrough
CT: control target
= control target key end

     0   :  { %15 = vsyncpa [#allocation5], 0  ;;  %s2239_s0 = inlined_call_operand.<no memory space> [shape: s32[1], index: 0, kind: input, shape index: {}]   ;;  %s2240_s1 = inlined_call_operand.hbm [shape: f32[8,256], index: 1, kind: input, shape index: {}]   ;;  %s2241_s2 = inlined_call_operand.hbm [shape: bf16[256,128], index: 2, kind: input, shape index: {}]   ;;  %s2242_s3 = inlined_call_operand.hbm [shape: bf16[128,128], index: 3, kind: input, shape index: {}]   ;;  %s2243_s4 = inlined_call_operand.hbm [shape: bf16[128,128], index: 4, kind: input, shape index: {}]   ;;  %s2244_s5 = inlined_call_operand.hbm [shape: bf16[128,128], index: 5, kind: input, shape index: {}]   ;;  %s2245_s6 = inlined_call_operand.hbm [shape: bf16[128,128], index: 6, kind: input, shape index: {}]   ;;  %s2246_s7 = inlined_call_operand.hbm [shape: bf16[128,128], index: 7, kind: input, shape index: {}]   ;;  %s2247_s8 = inlined_call_operand.vmem [shape: f32[16,128], index: 8, kind: input, shape index: {}]   ;;  %s2248_s9 = inlined_call_operand.hbm [shape: f32[8,128], index: 9, kind: output, shape index: {}]  }
   0x1   :  { %16 = vsyncpa [#allocation8], 0 }
   0x2   :  { %17 = vsyncpa [#allocation11], 0 }
   0x3   :  { %18 = vsyncpa [#allocation14], 0 }
   0x4   :  { %19 = vsyncpa [#allocation6], 0  ;;  %s1939_s29 = smov [#allocation7]   ;;  %s1753_s12 = scalar_lea.hbm %s2241_s2, 2048 }
   0x5   :  { %s35_s30 = sshll.u32 %s1939_s29, 4  ;;  %p1754_p0 = scmp.ne.s32.totalorder %s2241_s2, %s1753_s12  ;;  %s36_s30 = int_to_ptr.vmem [resolvable:$true] %s35_s30 }
   0x6   :  { %p1757_p1 = scmp.lt.u32.totalorder %s1753_s12, %s2241_s2 }
   0x8   :  { %p1759_p2 = pnand %p1757_p1, %p1754_p0 }
   0xa   :  { %1762 = shalt.err (!%p1759_p2)
}
   0xb   :  { %s1763_s17 = scalar_lea.vmem %s36_s30, 2048  ;;  %p1768_p4 = scmp.lt.s32.totalorder %s36_s30, %s36_s30 }
   0xc   :  { %p1764_p3 = scmp.ne.s32.totalorder %s36_s30, %s1763_s17  ;;  %p1769_p5 = scmp.lt.s32.totalorder %s1763_s17, %s1763_s17 }
   0xe   :  { %p1770_p6 = por %p1769_p5, %p1768_p4 }
  0x10   :  { %p1771_p7 = pnand %p1770_p6, %p1764_p3 }
  0x12   :  { %1774 = shalt.err (!%p1771_p7)
}
  0x13   :  { %s1940_s18 = smov 64   ;;  %s1941_s19 = smov 4  }
  0x14   :  { %41 = dma.hbm_to_vmem [thread:$0]  %s2241_s2, 2048, %s36_s30, [#allocation8], %s1940_s18, %s1940_s18, %s1941_s19  }
  0x15   :  { %s1942_s22 = smov [#allocation10]   ;;  %s1943_s24 = smov [#allocation13]  }
  0x16   :  { %s59_s23 = sshll.u32 %s1942_s22, 4  ;;  %s83_s0 = sshll.u32 %s1943_s24, 4  ;;  %s60_s23 = int_to_ptr.vmem [resolvable:$true] %s59_s23  ;;  %s84_s0 = int_to_ptr.vmem [resolvable:$true] %s83_s0 }
  0x17   :  { %s1775_s27 = scalar_lea.hbm %s2243_s4, 1024 }
  0x18   :  { %p1776_p8 = scmp.ne.s32.totalorder %s2243_s4, %s1775_s27  ;;  %p1779_p9 = scmp.lt.u32.totalorder %s1775_s27, %s2243_s4 }
  0x1a   :  { %p1781_p10 = pnand %p1779_p9, %p1776_p8 }
  0x1c   :  { %1784 = shalt.err (!%p1781_p10)
}
  0x1d   :  { %s1785_s2 = scalar_lea.vmem %s60_s23, 1024  ;;  %p1790_p12 = scmp.lt.s32.totalorder %s60_s23, %s60_s23 }
  0x1e   :  { %p1786_p11 = scmp.ne.s32.totalorder %s60_s23, %s1785_s2  ;;  %p1791_p13 = scmp.lt.s32.totalorder %s1785_s2, %s1785_s2 }
  0x20   :  { %p1792_p0 = por %p1791_p13, %p1790_p12 }
  0x22   :  { %p1793_p1 = pnand %p1792_p0, %p1786_p11 }
  0x24   :  { %1796 = shalt.err (!%p1793_p1)
}
  0x25   :  { %65 = dma.hbm_to_vmem [thread:$0]  %s2243_s4, 1024, %s60_s23, [#allocation11], %s1940_s18, %s1940_s18, %s1941_s19  }
  0x26   :  { %s1797_s15 = scalar_lea.hbm %s2245_s6, 1024 }
  0x27   :  { %p1798_p2 = scmp.ne.s32.totalorder %s2245_s6, %s1797_s15  ;;  %p1801_p3 = scmp.lt.u32.totalorder %s1797_s15, %s2245_s6 }
  0x29   :  { %p1803_p4 = pnand %p1801_p3, %p1798_p2 }
  0x2b   :  { %1806 = shalt.err (!%p1803_p4)
}
  0x2c   :  { %s1807_s22 = scalar_lea.vmem %s84_s0, 1024  ;;  %p1812_p6 = scmp.lt.s32.totalorder %s84_s0, %s84_s0 }
  0x2d   :  { %p1808_p5 = scmp.ne.s32.totalorder %s84_s0, %s1807_s22  ;;  %p1813_p7 = scmp.lt.s32.totalorder %s1807_s22, %s1807_s22 }
  0x2f   :  { %p1814_p8 = por %p1813_p7, %p1812_p6 }
  0x31   :  { %p1815_p9 = pnand %p1814_p8, %p1808_p5 }
  0x33   :  { %1818 = shalt.err (!%p1815_p9)
}
  0x34   :  { %89 = dma.hbm_to_vmem [thread:$0]  %s2245_s6, 1024, %s84_s0, [#allocation14], %s1940_s18, %s1940_s18, %s1941_s19  }
  0x35   :  { %s1944_s24 = smov [#allocation4]   ;;  %s1945_s26 = smov [#allocation9]  }
  0x36   :  { %s26_s25 = sshll.u32 %s1944_s24, 4  ;;  %s47_s27 = sshll.u32 %s1945_s26, 4  ;;  %s27_s25 = int_to_ptr.vmem [resolvable:$true] %s26_s25  ;;  %s48_s27 = int_to_ptr.vmem [resolvable:$true] %s47_s27 }
  0x37   :  { %s1819_s10 = scalar_lea.hbm %s2240_s1, 256 }
  0x38   :  { %p1820_p10 = scmp.ne.s32.totalorder %s2240_s1, %s1819_s10  ;;  %p1823_p11 = scmp.lt.u32.totalorder %s1819_s10, %s2240_s1 }
  0x3a   :  { %p1825_p12 = pnand %p1823_p11, %p1820_p10 }
  0x3c   :  { %1828 = shalt.err (!%p1825_p12)
}
  0x3d   :  { %s1829_s6 = scalar_lea.vmem %s27_s25, 256  ;;  %p1834_p0 = scmp.lt.s32.totalorder %s27_s25, %s27_s25 }
  0x3e   :  { %p1830_p13 = scmp.ne.s32.totalorder %s27_s25, %s1829_s6  ;;  %p1835_p1 = scmp.lt.s32.totalorder %s1829_s6, %s1829_s6 }
  0x40   :  { %p1836_p2 = por %p1835_p1, %p1834_p0 }
  0x42   :  { %p1837_p3 = pnand %p1836_p2, %p1830_p13 }
  0x44   :  { %1840 = shalt.err (!%p1837_p3)
}
  0x45   :  { %29 = dma.hbm_to_vmem [thread:$0]  %s2240_s1, 256, %s27_s25, [#allocation5]  }
  0x46   :  { %s1841_s16 = scalar_lea.hbm %s2242_s3, 1024 }
  0x47   :  { %p1842_p4 = scmp.ne.s32.totalorder %s2242_s3, %s1841_s16  ;;  %p1845_p5 = scmp.lt.u32.totalorder %s1841_s16, %s2242_s3 }
  0x49   :  { %p1847_p6 = pnand %p1845_p5, %p1842_p4 }
  0x4b   :  { %1850 = shalt.err (!%p1847_p6)
}
  0x4c   :  { %s1851_s4 = scalar_lea.vmem %s48_s27, 1024  ;;  %p1856_p8 = scmp.lt.s32.totalorder %s48_s27, %s48_s27 }
  0x4d   :  { %p1852_p7 = scmp.ne.s32.totalorder %s48_s27, %s1851_s4  ;;  %p1857_p9 = scmp.lt.s32.totalorder %s1851_s4, %s1851_s4 }
  0x4f   :  { %p1858_p10 = por %p1857_p9, %p1856_p8 }
  0x51   :  { %p1859_p11 = pnand %p1858_p10, %p1852_p7 }
  0x53   :  { %1862 = shalt.err (!%p1859_p11)
}
  0x54   :  { %53 = dma.hbm_to_vmem [thread:$0]  %s2242_s3, 1024, %s48_s27, [#allocation8], %s1940_s18, %s1940_s18, %s1941_s19  }
  0x55   :  { %s1946_s24 = smov [#allocation12]   ;;  %s1947_s26 = smov [#allocation15]  }
  0x56   :  { %s71_s25 = sshll.u32 %s1946_s24, 4  ;;  %s95_s28 = sshll.u32 %s1947_s26, 4  ;;  %s72_s25 = int_to_ptr.vmem [resolvable:$true] %s71_s25  ;;  %s96_s28 = int_to_ptr.vmem [resolvable:$true] %s95_s28 }
  0x57   :  { %s1863_s11 = scalar_lea.hbm %s2244_s5, 1024 }
  0x58   :  { %p1864_p12 = scmp.ne.s32.totalorder %s2244_s5, %s1863_s11  ;;  %p1867_p13 = scmp.lt.u32.totalorder %s1863_s11, %s2244_s5 }
  0x5a   :  { %p1869_p0 = pnand %p1867_p13, %p1864_p12 }
  0x5c   :  { %1872 = shalt.err (!%p1869_p0)
}
  0x5d   :  { %s1873_s3 = scalar_lea.vmem %s72_s25, 1024  ;;  %p1878_p2 = scmp.lt.s32.totalorder %s72_s25, %s72_s25 }
  0x5e   :  { %p1874_p1 = scmp.ne.s32.totalorder %s72_s25, %s1873_s3  ;;  %p1879_p3 = scmp.lt.s32.totalorder %s1873_s3, %s1873_s3 }
  0x60   :  { %p1880_p4 = por %p1879_p3, %p1878_p2 }
  0x62   :  { %p1881_p5 = pnand %p1880_p4, %p1874_p1 }
  0x64   :  { %1884 = shalt.err (!%p1881_p5)
}
  0x65   :  { %77 = dma.hbm_to_vmem [thread:$0]  %s2244_s5, 1024, %s72_s25, [#allocation11], %s1940_s18, %s1940_s18, %s1941_s19  }
  0x66   :  { %s1885_s15 = scalar_lea.hbm %s2246_s7, 1024 }
  0x67   :  { %p1886_p6 = scmp.ne.s32.totalorder %s2246_s7, %s1885_s15  ;;  %p1889_p7 = scmp.lt.u32.totalorder %s1885_s15, %s2246_s7 }
  0x69   :  { %p1891_p8 = pnand %p1889_p7, %p1886_p6 }
  0x6b   :  { %1894 = shalt.err (!%p1891_p8)
}
  0x6c   :  { %s1895_s22 = scalar_lea.vmem %s96_s28, 1024  ;;  %p1900_p10 = scmp.lt.s32.totalorder %s96_s28, %s96_s28 }
  0x6d   :  { %p1896_p9 = scmp.ne.s32.totalorder %s96_s28, %s1895_s22  ;;  %p1901_p11 = scmp.lt.s32.totalorder %s1895_s22, %s1895_s22 }
  0x6f   :  { %p1902_p12 = por %p1901_p11, %p1900_p10 }
  0x71   :  { %p1903_p13 = pnand %p1902_p12, %p1896_p9 }
  0x73   :  { %1906 = shalt.err (!%p1903_p13)
}
  0x74   :  { %101 = dma.hbm_to_vmem [thread:$0]  %s2246_s7, 1024, %s96_s28, [#allocation14], %s1940_s18, %s1940_s18, %s1941_s19  }
  0x75   :  { %1929 = dma.done.wait [#allocation5], 256  }
  0x76   :  { %1930 = vsyncadd [#allocation5], 4294967040 }
  0x77   :  { %1931 = dma.done.wait [#allocation8], 3072  }
  0x78   :  { %1932 = vsyncadd [#allocation8], 4294964224 }
  0x79   :  { %1933 = dma.done.wait [#allocation11], 2048  }
  0x7a   :  { %1934 = vsyncadd [#allocation11], 4294965248 }
  0x7b   :  { %1935 = dma.done.wait [#allocation14], 2048  }
  0x7c   :  { %1936 = vsyncadd [#allocation14], 4294965248  ;;  %v125_v0 = vld [vmem:[#allocation4] sm:$0xff]  ;;  %v126_v1 = vld [vmem:[#allocation4 + $0x8] sm:$0xff]  ;;  %v1948_v26 = vmov 0.0|0.0   ;;  %v201_v28 = vlaneseq  ;;  %vm1949_vm0 = vmmov 0  }
  0x7d   :  { %v1218_v2 = vld [vmem:[#allocation7 + $0x40] sm:$0xff]   ;;  %v127_v3 = vmul.f32 %v125_v0, %v125_v0  ;;  %v128_v4 = vmul.f32 %v126_v1, %v126_v1  ;;  %v1219_v6 = vld [vmem:[#allocation7 + $0x48] sm:$0xff]   ;;  %v1220_v9 = vld [vmem:[#allocation7 + $0x50] sm:$0xff]   ;;  %1588 = vmatprep.subr.bf16.mxu1 %v1948_v26  ;;  %v1950_v46 = vmov 0.0  }
  0x7e   :  { %1557 = vmatprep.subr.bf16.mxu0 %v1218_v2  ;;  %v988_v5 = vld [vmem:[#allocation7] sm:$0xff]   ;;  %v1211_v8 = vld [vmem:[#allocation7 + $0x8] sm:$0xff]   ;;  %v1212_v10 = vld [vmem:[#allocation7 + $0x10] sm:$0xff]   ;;  %v2108_v29 = vshrl.u32 %v201_v28, 7  ;;  %1413 = vmatprep.mubr.msk.f32.mxu1 %vm1949_vm0, %v1950_v46 }
  0x7f   :  { %1559 = vmatpush3.bf16.msra.mxu0 %v988_v5  ;;  %v129_v7 = vadd.f32 %v128_v4, %v127_v3  ;;  %v1221_v11 = vld [vmem:[#allocation7 + $0x58] sm:$0xff]   ;;  %v1222_v13 = vld [vmem:[#allocation7 + $0x60] sm:$0xff]   ;;  %v1223_v15 = vld [vmem:[#allocation7 + $0x68] sm:$0xff]  }
  0x80   :  { %1561 = vmatprep.subr.bf16.mxu0 %v1219_v6  ;;  %v1213_v12 = vld [vmem:[#allocation7 + $0x18] sm:$0xff]   ;;  %v1214_v14 = vld [vmem:[#allocation7 + $0x20] sm:$0xff]   ;;  %v1215_v16 = vld [vmem:[#allocation7 + $0x28] sm:$0xff]   ;;  %v203_v30 = vsub.s32 0, %v2108_v29  ;;  %v298_v57 = vsub.s32 5, %v2108_v29  ;;  %v303_v58 = vsub.s32 2, %v2108_v29 }
  0x81   :  { %130 = vadd.xlane.f32.xlu0 %v129_v7  ;;  %v1224_v17 = vld [vmem:[#allocation7 + $0x70] sm:$0xff]   ;;  %v1225_v19 = vld [vmem:[#allocation7 + $0x78] sm:$0xff]   ;;  %v1052_v25 = vld [vmem:[#allocation9] sm:$0xff]   ;;  %v340_v5 = vsub.s32 1, %v2108_v29 }
  0x82   :  { %v1216_v18 = vld [vmem:[#allocation7 + $0x30] sm:$0xff]   ;;  %v1217_v20 = vld [vmem:[#allocation7 + $0x38] sm:$0xff]   ;;  %1590 = vmatpush3.bf16.msra.mxu1 %v1052_v25  ;;  %v1226_v27 = vld [vmem:[#allocation9 + $0x8] sm:$0xff]  }
  0x83   :  { %1563 = vmatpush3.bf16.msra.mxu0 %v1211_v8  ;;  %1591 = vmatprep.subr.bf16.mxu1 %v1948_v26  ;;  %v2114_v31 = vld [vmem:[%s2247_s8] sm:$0xff]  ;;  %v1228_v44 = vld [vmem:[#allocation9 + $0x18] sm:$0xff]   ;;  %v1229_v45 = vld [vmem:[#allocation9 + $0x20] sm:$0xff]  }
  0x84   :  { %1565 = vmatprep.subr.bf16.mxu0 %v1220_v9  ;;  %v204_v33 = vrot.slane %v2114_v31, %v203_v30  ;;  %v1227_v43 = vld [vmem:[#allocation9 + $0x10] sm:$0xff]   ;;  %v1230_v47 = vld [vmem:[#allocation9 + $0x28] sm:$0xff]   ;;  %v1232_v49 = vld [vmem:[#allocation9 + $0x38] sm:$0xff]   ;;  %v299_v61 = vrot.slane %v2114_v31, %v298_v57  ;;  %v341_v6 = vrot.slane %v2114_v31, %v340_v5 }
  0x85   :  { %v1231_v48 = vld [vmem:[#allocation9 + $0x30] sm:$0xff]   ;;  %v2134_v59 = vld [vmem:[%s2247_s8 + $0x8] sm:$0xff]  ;;  %v1084_v3 = vld [vmem:[#allocation10] sm:$0xff]   ;;  %s1951_s8 = smov [#allocation16]  }
  0x86   :  { %1593 = vmatpush3.bf16.msra.mxu1 %v1226_v27  ;;  %v1233_v4 = vld [vmem:[#allocation10 + $0x8] sm:$0xff]   ;;  %s970_s23 = sshll.u32 %s1951_s8, 4  ;;  %s971_s23 = int_to_ptr.vmem [resolvable:$true] %s970_s23 }
  0x87   :  { %1567 = vmatpush3.bf16.msra.mxu0 %v1212_v10  ;;  %1594 = vmatprep.subr.bf16.mxu1 %v1948_v26  ;;  %s1907_s24 = scalar_lea.vmem %s971_s23, 128  ;;  %p1912_p1 = scmp.lt.s32.totalorder %s971_s23, %s971_s23 }
  0x88   :  { %1569 = vmatprep.subr.bf16.mxu0 %v1221_v11  ;;  %p1908_p0 = scmp.ne.s32.totalorder %s971_s23, %s1907_s24  ;;  %p1913_p2 = scmp.lt.s32.totalorder %s1907_s24, %s1907_s24 }
  0x8a   :  { %1596 = vmatpush3.bf16.msra.mxu1 %v1227_v43  ;;  %v1116_v43 = vld [vmem:[#allocation12] sm:$0xff]   ;;  %p1914_p3 = por %p1913_p2, %p1912_p1 }
  0x8b   :  { %1571 = vmatpush3.bf16.msra.mxu0 %v1213_v12  ;;  %1597 = vmatprep.subr.bf16.mxu1 %v1948_v26 }
  0x8c   :  { %1573 = vmatprep.subr.bf16.mxu0 %v1222_v13  ;;  %p1915_p4 = pnand %p1914_p3, %p1908_p0 }
  0x8e   :  { %1599 = vmatpush3.bf16.msra.mxu1 %v1228_v44  ;;  %v1240_v44 = vld [vmem:[#allocation12 + $0x8] sm:$0xff]  }
  0x8f   :  { %1575 = vmatpush3.bf16.msra.mxu0 %v1214_v14  ;;  %1600 = vmatprep.subr.bf16.mxu1 %v1948_v26 }
  0x90   :  { %1577 = vmatprep.subr.bf16.mxu0 %v1223_v15 }
  0x92   :  { %1602 = vmatpush3.bf16.msra.mxu1 %v1229_v45  ;;  %v479_v45 = vrot.slane %v2114_v31, %v303_v58 }
  0x93   :  { %1579 = vmatpush3.bf16.msra.mxu0 %v1215_v16  ;;  %1603 = vmatprep.subr.bf16.mxu1 %v1948_v26 }
  0x94   :  { %1581 = vmatprep.subr.bf16.mxu0 %v1224_v17  ;;  %v1234_v17 = vld [vmem:[#allocation10 + $0x10] sm:$0xff]  }
  0x96   :  { %1605 = vmatpush3.bf16.msra.mxu1 %v1230_v47 }
  0x97   :  { %1583 = vmatpush3.bf16.msra.mxu0 %v1216_v18  ;;  %1606 = vmatprep.subr.bf16.mxu1 %v1948_v26  ;;  %v1235_v18 = vld [vmem:[#allocation10 + $0x18] sm:$0xff]  }
  0x98   :  { %1585 = vmatprep.subr.bf16.mxu0 %v1225_v19  ;;  %v1236_v19 = vld [vmem:[#allocation10 + $0x20] sm:$0xff]  }
  0x9a   :  { %1608 = vmatpush3.bf16.msra.mxu1 %v1231_v48 }
  0x9b   :  { %1587 = vmatpush3.bf16.msra.mxu0 %v1217_v20  ;;  %1609 = vmatprep.subr.bf16.mxu1 %v1948_v26  ;;  %v1237_v20 = vld [vmem:[#allocation10 + $0x28] sm:$0xff]  }
  0x9c   :  { %1612 = vmatprep.subr.bf16.mxu0 %v1948_v26 }
  0x9e   :  { %1611 = vmatpush3.bf16.msra.mxu1 %v1232_v49 }
  0x9f   :  { %1636 = vmatprep.subr.bf16.mxu1 %v1948_v26 }
 0x10e   :  { %v131_v21 = vpop.xlane.xlu0 %130 }
 0x10f   :  { %1721 = vrsqrt.f32 %v131_v21  ;;  %v1238_v21 = vld [vmem:[#allocation10 + $0x30] sm:$0xff]  }
 0x119   :  { %v1722_v22 = vpop.eup %1721 }
 0x11a   :  { %v134_v23 = vmul.f32 %v1722_v22, %v126_v1  ;;  %v133_v24 = vmul.f32 %v1722_v22, %v125_v0  ;;  %v304_v0 = vrot.slane %v2134_v59, %v303_v58  ;;  %v1239_v22 = vld [vmem:[#allocation10 + $0x38] sm:$0xff]  }
 0x11b   :  { %v1242_v58 = vld [vmem:[#allocation12 + $0x18] sm:$0xff]  }
 0x11c   :  { %269 = vmatprep.mubr.f32.mxu0 %v134_v23 }
 0x11d   :  { %270 = vmatmul.mubr.f32.vlgmr.msra.gmra.mrb[0].mxu0 %v133_v24 }
 0x11e   :  { %1448 = vmatprep.mubr.msk.f32.mxu0 %vm1949_vm0, %v1950_v46  ;;  %1614 = vmatpush3.bf16.msra.mxu0 %v1084_v3 }
 0x11f   :  { %1615 = vmatprep.subr.bf16.mxu0 %v1948_v26 }
 0x122   :  { %1617 = vmatpush3.bf16.msra.mxu0 %v1233_v4 }
 0x123   :  { %1618 = vmatprep.subr.bf16.mxu0 %v1948_v26 }
 0x126   :  { %1620 = vmatpush3.bf16.msra.mxu0 %v1234_v17 }
 0x127   :  { %1621 = vmatprep.subr.bf16.mxu0 %v1948_v26 }
 0x12a   :  { %1623 = vmatpush3.bf16.msra.mxu0 %v1235_v18 }
 0x12b   :  { %1624 = vmatprep.subr.bf16.mxu0 %v1948_v26 }
 0x12e   :  { %1626 = vmatpush3.bf16.msra.mxu0 %v1236_v19  ;;  %v1148_v19 = vld [vmem:[#allocation13] sm:$0xff]  }
 0x12f   :  { %1627 = vmatprep.subr.bf16.mxu0 %v1948_v26 }
 0x132   :  { %1629 = vmatpush3.bf16.msra.mxu0 %v1237_v20  ;;  %v1247_v20 = vld [vmem:[#allocation13 + $0x8] sm:$0xff]  }
 0x133   :  { %1630 = vmatprep.subr.bf16.mxu0 %v1948_v26 }
 0x136   :  { %1632 = vmatpush3.bf16.msra.mxu0 %v1238_v21 }
 0x137   :  { %1633 = vmatprep.subr.bf16.mxu0 %v1948_v26 }
 0x13a   :  { %1635 = vmatpush3.bf16.msra.mxu0 %v1239_v22 }
 0x13b   :  { %1660 = vmatprep.subr.bf16.mxu0 %v1948_v26 }
 0x1f0   :  { %v1293_v32 = vpop.f32.mrb[0].mxu0 }
 0x1f1   :  { %v1294_v34 = vpop.f32.mrb[1].mxu0 }
 0x1f2   :  { %v1295_v35 = vadd.f32 %v1294_v34, %v1293_v32  ;;  %v435_v34 = vsub.s32 6, %v2108_v29 }
 0x1f4   :  { %v272_v36 = vadd.f32 %v1295_v35, %v204_v33  ;;  %v440_v35 = vsub.s32 3, %v2108_v29 }
 0x1f6   :  { %v982_v37 = vmul.f32 -1.442695, %v272_v36  ;;  %v617_v21 = vrot.slane %v2114_v31, %v440_v35 }
 0x1f8   :  { %1723 = vpow2.f32 %v982_v37  ;;  %v436_v37 = vrot.slane %v2114_v31, %v435_v34 }
 0x202   :  { %v1724_v38 = vpop.eup %1723 }
 0x203   :  { %v278_v39 = vadd.f32 1.0, %v1724_v38 }
 0x205   :  { %1725 = vrcp.f32 %v278_v39 }
 0x20f   :  { %v1726_v40 = vpop.eup %1725 }
 0x210   :  { %v281_v41 = vmul.f32 %v1726_v40, %v272_v36  ;;  %v441_v40 = vrot.slane %v2134_v59, %v440_v35  ;;  %v1249_v35 = vld [vmem:[#allocation13 + $0x18] sm:$0xff]  }
 0x212   :  { %282 = vadd.xlane.f32.xlu0 %v281_v41  ;;  %v286_v42 = vmul.f32 %v281_v41, %v281_v41 }
 0x214   :  { %287 = vadd.xlane.f32.xlu1 %v286_v42 }
 0x29f   :  { %v283_v50 = vpop.xlane.xlu0 %282 }
 0x2a0   :  { %v285_v51 = vmul.f32 0.0078125, %v283_v50 }
 0x2a1   :  { %v288_v52 = vpop.xlane.xlu1 %287 }
 0x2a2   :  { %v290_v53 = vmul.f32 %v285_v51, %v285_v51  ;;  %v289_v54 = vmul.f32 0.0078125, %v288_v52  ;;  %v292_v60 = vsub.f32 %v281_v41, %v285_v51 }
 0x2a4   :  { %v291_v55 = vsub.f32 %v289_v54, %v290_v53 }
 0x2a6   :  { %v293_v56 = vadd.f32 0.1, %v291_v55 }
 0x2a8   :  { %1727 = vrsqrt.f32 %v293_v56 }
 0x2b2   :  { %v1728_v62 = vpop.eup %1727 }
 0x2b3   :  { %v295_v63 = vmul.f32 %v1728_v62, %v292_v60  ;;  %v1243_v62 = vld [vmem:[#allocation12 + $0x20] sm:$0xff]  }
 0x2b5   :  { %v300_v1 = vmul.f32 %v299_v61, %v295_v63  ;;  %v1241_v61 = vld [vmem:[#allocation12 + $0x10] sm:$0xff]   ;;  %v1244_v63 = vld [vmem:[#allocation12 + $0x28] sm:$0xff]  }
 0x2b7   :  { %v2142_v2 = vadd.f32 %v304_v0, %v300_v1  ;;  %v1245_v0 = vld [vmem:[#allocation12 + $0x30] sm:$0xff]   ;;  %v1246_v1 = vld [vmem:[#allocation12 + $0x38] sm:$0xff]  }
 0x2b9   :  { %1414 = vmatmul.mubr.f32.vlgmr.msra.gmra.mrb[0].mxu1 %v2142_v2 }
 0x2ba   :  { %1483 = vmatprep.mubr.msk.f32.mxu1 %vm1949_vm0, %v1950_v46  ;;  %1638 = vmatpush3.bf16.msra.mxu1 %v1116_v43 }
 0x2bb   :  { %1639 = vmatprep.subr.bf16.mxu1 %v1948_v26 }
 0x2be   :  { %1641 = vmatpush3.bf16.msra.mxu1 %v1240_v44 }
 0x2bf   :  { %1642 = vmatprep.subr.bf16.mxu1 %v1948_v26 }
 0x2c2   :  { %1644 = vmatpush3.bf16.msra.mxu1 %v1241_v61  ;;  %v1180_v61 = vld [vmem:[#allocation15] sm:$0xff]  }
 0x2c3   :  { %1645 = vmatprep.subr.bf16.mxu1 %v1948_v26 }
 0x2c6   :  { %1647 = vmatpush3.bf16.msra.mxu1 %v1242_v58  ;;  %v1254_v58 = vld [vmem:[#allocation15 + $0x8] sm:$0xff]  }
 0x2c7   :  { %1648 = vmatprep.subr.bf16.mxu1 %v1948_v26 }
 0x2ca   :  { %1650 = vmatpush3.bf16.msra.mxu1 %v1243_v62 }
 0x2cb   :  { %1651 = vmatprep.subr.bf16.mxu1 %v1948_v26 }
 0x2ce   :  { %1653 = vmatpush3.bf16.msra.mxu1 %v1244_v63 }
 0x2cf   :  { %1654 = vmatprep.subr.bf16.mxu1 %v1948_v26 }
 0x2d2   :  { %1656 = vmatpush3.bf16.msra.mxu1 %v1245_v0 }
 0x2d3   :  { %1657 = vmatprep.subr.bf16.mxu1 %v1948_v26 }
 0x2d6   :  { %1659 = vmatpush3.bf16.msra.mxu1 %v1246_v1 }
 0x2d7   :  { %1684 = vmatprep.subr.bf16.mxu1 %v1948_v26 }
 0x38c   :  { %v408_v7 = vpop.f32.mrb[0].mxu1 }
 0x38d   :  { %v409_v8 = vadd.f32 %v408_v7, %v341_v6  ;;  %v1415_v9 = vpop.f32.mrb[1].mxu1 }
 0x38f   :  { %v412_v10 = vadd.f32 %v409_v8, %v2142_v2 }
 0x391   :  { %v983_v11 = vmul.f32 -1.442695, %v412_v10 }
 0x393   :  { %1729 = vpow2.f32 %v983_v11  ;;  %v578_v11 = vsub.s32 4, %v2108_v29 }
 0x39d   :  { %v1730_v12 = vpop.eup %1729 }
 0x39e   :  { %v416_v13 = vadd.f32 1.0, %v1730_v12 }
 0x3a0   :  { %1731 = vrcp.f32 %v416_v13 }
 0x3aa   :  { %v1732_v14 = vpop.eup %1731 }
 0x3ab   :  { %v419_v15 = vmul.f32 %v1732_v14, %v412_v10  ;;  %v573_v10 = vsub.s32 7, %v2108_v29 }
 0x3ad   :  { %420 = vadd.xlane.f32.xlu1 %v419_v15  ;;  %v423_v16 = vmul.f32 %v419_v15, %v419_v15  ;;  %v574_v13 = vrot.slane %v2114_v31, %v573_v10 }
 0x3af   :  { %424 = vadd.xlane.f32.xlu0 %v423_v16  ;;  %v579_v16 = vrot.slane %v2134_v59, %v578_v11 }
 0x43a   :  { %v421_v23 = vpop.xlane.xlu1 %420 }
 0x43b   :  { %v422_v24 = vmul.f32 0.0078125, %v421_v23 }
 0x43c   :  { %v425_v25 = vpop.xlane.xlu0 %424 }
 0x43d   :  { %v427_v27 = vmul.f32 %v422_v24, %v422_v24  ;;  %v426_v28 = vmul.f32 0.0078125, %v425_v25  ;;  %v429_v36 = vsub.f32 %v419_v15, %v422_v24 }
 0x43f   :  { %v428_v32 = vsub.f32 %v426_v28, %v427_v27 }
 0x441   :  { %v430_v33 = vadd.f32 0.1, %v428_v32 }
 0x443   :  { %1733 = vrsqrt.f32 %v430_v33 }
 0x44d   :  { %v1734_v38 = vpop.eup %1733 }
 0x44e   :  { %v432_v39 = vmul.f32 %v1734_v38, %v429_v36  ;;  %v1248_v38 = vld [vmem:[#allocation13 + $0x10] sm:$0xff]  }
 0x450   :  { %v437_v41 = vmul.f32 %v436_v37, %v432_v39  ;;  %v1250_v39 = vld [vmem:[#allocation13 + $0x20] sm:$0xff]  }
 0x452   :  { %v442_v42 = vadd.f32 %v441_v40, %v437_v41  ;;  %v1251_v40 = vld [vmem:[#allocation13 + $0x28] sm:$0xff]   ;;  %v1252_v41 = vld [vmem:[#allocation13 + $0x30] sm:$0xff]  }
 0x454   :  { %1449 = vmatmul.mubr.f32.vlgmr.msra.gmra.mrb[2].mxu0 %v442_v42  ;;  %v443_v48 = vadd.f32 %v442_v42, %v2142_v2  ;;  %v1253_v42 = vld [vmem:[#allocation13 + $0x38] sm:$0xff]  }
 0x455   :  { %1518 = vmatprep.mubr.msk.f32.mxu0 %vm1949_vm0, %v1950_v46  ;;  %1662 = vmatpush3.bf16.msra.mxu0 %v1148_v19 }
 0x456   :  { %1663 = vmatprep.subr.bf16.mxu0 %v1948_v26 }
 0x459   :  { %1665 = vmatpush3.bf16.msra.mxu0 %v1247_v20 }
 0x45a   :  { %1666 = vmatprep.subr.bf16.mxu0 %v1948_v26 }
 0x45d   :  { %1668 = vmatpush3.bf16.msra.mxu0 %v1248_v38 }
 0x45e   :  { %1669 = vmatprep.subr.bf16.mxu0 %v1948_v26 }
 0x461   :  { %1671 = vmatpush3.bf16.msra.mxu0 %v1249_v35 }
 0x462   :  { %1672 = vmatprep.subr.bf16.mxu0 %v1948_v26 }
 0x465   :  { %1674 = vmatpush3.bf16.msra.mxu0 %v1250_v39 }
 0x466   :  { %1675 = vmatprep.subr.bf16.mxu0 %v1948_v26 }
 0x469   :  { %1677 = vmatpush3.bf16.msra.mxu0 %v1251_v40 }
 0x46a   :  { %1678 = vmatprep.subr.bf16.mxu0 %v1948_v26 }
 0x46d   :  { %1680 = vmatpush3.bf16.msra.mxu0 %v1252_v41 }
 0x46e   :  { %1681 = vmatprep.subr.bf16.mxu0 %v1948_v26 }
 0x471   :  { %1683 = vmatpush3.bf16.msra.mxu0 %v1253_v42 }
 0x527   :  { %v546_v47 = vpop.f32.mrb[2].mxu0 }
 0x528   :  { %v547_v49 = vadd.f32 %v546_v47, %v479_v45  ;;  %v1450_v50 = vpop.f32.mrb[3].mxu0 }
 0x52a   :  { %v550_v51 = vadd.f32 %v547_v49, %v443_v48 }
 0x52c   :  { %v984_v52 = vmul.f32 -1.442695, %v550_v51 }
 0x52e   :  { %1735 = vpow2.f32 %v984_v52 }
 0x538   :  { %v1736_v53 = vpop.eup %1735 }
 0x539   :  { %v554_v54 = vadd.f32 1.0, %v1736_v53 }
 0x53b   :  { %1737 = vrcp.f32 %v554_v54 }
 0x545   :  { %v1738_v55 = vpop.eup %1737 }
 0x546   :  { %v557_v56 = vmul.f32 %v1738_v55, %v550_v51  ;;  %v712_v51 = vrot.slane %v2134_v59, %v203_v30  ;;  %v717_v55 = vrot.slane %v2134_v59, %v298_v57  ;;  %v755_v30 = vrot.slane %v2114_v31, %v578_v11  ;;  %v1256_v31 = vld [vmem:[#allocation15 + $0x18] sm:$0xff]   ;;  %v1257_v11 = vld [vmem:[#allocation15 + $0x20] sm:$0xff]  }
 0x548   :  { %558 = vadd.xlane.f32.xlu1 %v557_v56  ;;  %v561_v60 = vmul.f32 %v557_v56, %v557_v56 }
 0x54a   :  { %562 = vadd.xlane.f32.xlu0 %v561_v60 }
 0x5d5   :  { %v559_v2 = vpop.xlane.xlu1 %558 }
 0x5d6   :  { %v560_v3 = vmul.f32 0.0078125, %v559_v2 }
 0x5d7   :  { %v563_v4 = vpop.xlane.xlu0 %562 }
 0x5d8   :  { %v565_v6 = vmul.f32 %v560_v3, %v560_v3  ;;  %v564_v7 = vmul.f32 0.0078125, %v563_v4  ;;  %v567_v12 = vsub.f32 %v557_v56, %v560_v3 }
 0x5da   :  { %v566_v8 = vsub.f32 %v564_v7, %v565_v6 }
 0x5dc   :  { %v568_v9 = vadd.f32 0.1, %v566_v8 }
 0x5de   :  { %1739 = vrsqrt.f32 %v568_v9  ;;  %v1255_v9 = vld [vmem:[#allocation15 + $0x10] sm:$0xff]  }
 0x5e8   :  { %v1740_v14 = vpop.eup %1739 }
 0x5e9   :  { %v570_v15 = vmul.f32 %v1740_v14, %v567_v12  ;;  %v1258_v12 = vld [vmem:[#allocation15 + $0x28] sm:$0xff]   ;;  %v1260_v14 = vld [vmem:[#allocation15 + $0x38] sm:$0xff]  }
 0x5eb   :  { %v575_v17 = vmul.f32 %v574_v13, %v570_v15  ;;  %v1259_v13 = vld [vmem:[#allocation15 + $0x30] sm:$0xff]  }
 0x5ed   :  { %v580_v18 = vadd.f32 %v579_v16, %v575_v17 }
 0x5ef   :  { %1484 = vmatmul.mubr.f32.vlgmr.msra.gmra.mrb[2].mxu1 %v580_v18  ;;  %v581_v23 = vadd.f32 %v580_v18, %v443_v48 }
 0x5f0   :  { %1553 = vmatprep.mubr.msk.f32.mxu1 %vm1949_vm0, %v1950_v46  ;;  %1686 = vmatpush3.bf16.msra.mxu1 %v1180_v61 }
 0x5f1   :  { %1687 = vmatprep.subr.bf16.mxu1 %v1948_v26 }
 0x5f4   :  { %1689 = vmatpush3.bf16.msra.mxu1 %v1254_v58 }
 0x5f5   :  { %1690 = vmatprep.subr.bf16.mxu1 %v1948_v26 }
 0x5f8   :  { %1692 = vmatpush3.bf16.msra.mxu1 %v1255_v9 }
 0x5f9   :  { %1693 = vmatprep.subr.bf16.mxu1 %v1948_v26 }
 0x5fc   :  { %1695 = vmatpush3.bf16.msra.mxu1 %v1256_v31 }
 0x5fd   :  { %1696 = vmatprep.subr.bf16.mxu1 %v1948_v26 }
 0x600   :  { %1698 = vmatpush3.bf16.msra.mxu1 %v1257_v11 }
 0x601   :  { %1699 = vmatprep.subr.bf16.mxu1 %v1948_v26 }
 0x604   :  { %1701 = vmatpush3.bf16.msra.mxu1 %v1258_v12 }
 0x605   :  { %1702 = vmatprep.subr.bf16.mxu1 %v1948_v26 }
 0x608   :  { %1704 = vmatpush3.bf16.msra.mxu1 %v1259_v13 }
 0x609   :  { %1705 = vmatprep.subr.bf16.mxu1 %v1948_v26  ;;  %v855_v26 = vrot.slane %v2134_v59, %v435_v34 }
 0x60c   :  { %1707 = vmatpush3.bf16.msra.mxu1 %v1260_v14 }
 0x6c2   :  { %v684_v22 = vpop.f32.mrb[2].mxu1 }
 0x6c3   :  { %v685_v24 = vadd.f32 %v684_v22, %v617_v21  ;;  %v1485_v25 = vpop.f32.mrb[3].mxu1  ;;  %v850_v22 = vrot.slane %v2134_v59, %v340_v5 }
 0x6c5   :  { %v688_v27 = vadd.f32 %v685_v24, %v581_v23 }
 0x6c7   :  { %v985_v28 = vmul.f32 -1.442695, %v688_v27 }
 0x6c9   :  { %1741 = vpow2.f32 %v985_v28 }
 0x6d3   :  { %v1742_v46 = vpop.eup %1741 }
 0x6d4   :  { %v692_v32 = vadd.f32 1.0, %v1742_v46  ;;  %v892_v46 = vrot.slane %v2134_v59, %v573_v10 }
 0x6d6   :  { %1743 = vrcp.f32 %v692_v32 }
 0x6e0   :  { %v1744_v33 = vpop.eup %1743 }
 0x6e1   :  { %v695_v36 = vmul.f32 %v1744_v33, %v688_v27 }
 0x6e3   :  { %696 = vadd.xlane.f32.xlu1 %v695_v36  ;;  %v699_v37 = vmul.f32 %v695_v36, %v695_v36 }
 0x6e5   :  { %700 = vadd.xlane.f32.xlu0 %v699_v37 }
 0x770   :  { %v697_v43 = vpop.xlane.xlu1 %696 }
 0x771   :  { %v698_v44 = vmul.f32 0.0078125, %v697_v43 }
 0x772   :  { %v701_v45 = vpop.xlane.xlu0 %700 }
 0x773   :  { %v703_v47 = vmul.f32 %v698_v44, %v698_v44  ;;  %v702_v48 = vmul.f32 0.0078125, %v701_v45  ;;  %v705_v52 = vsub.f32 %v695_v36, %v698_v44 }
 0x775   :  { %v704_v49 = vsub.f32 %v702_v48, %v703_v47 }
 0x777   :  { %v706_v50 = vadd.f32 0.1, %v704_v49 }
 0x779   :  { %1745 = vrsqrt.f32 %v706_v50 }
 0x783   :  { %v1746_v53 = vpop.eup %1745 }
 0x784   :  { %v708_v54 = vmul.f32 %v1746_v53, %v705_v52 }
 0x786   :  { %v713_v56 = vmul.f32 %v712_v51, %v708_v54 }
 0x788   :  { %v718_v60 = vadd.f32 %v717_v55, %v713_v56 }
 0x78a   :  { %1519 = vmatmul.mubr.f32.vlgmr.msra.gmra.mrb[4].mxu0 %v718_v60  ;;  %v719_v63 = vadd.f32 %v718_v60, %v581_v23 }
 0x85d   :  { %v822_v62 = vpop.f32.mrb[4].mxu0 }
 0x85e   :  { %v823_v0 = vadd.f32 %v822_v62, %v755_v30  ;;  %v1520_v1 = vpop.f32.mrb[5].mxu0 }
 0x860   :  { %v826_v57 = vadd.f32 %v823_v0, %v719_v63 }
 0x862   :  { %v986_v2 = vmul.f32 -1.442695, %v826_v57 }
 0x864   :  { %1747 = vpow2.f32 %v986_v2 }
 0x86e   :  { %v1748_v3 = vpop.eup %1747 }
 0x86f   :  { %v830_v4 = vadd.f32 1.0, %v1748_v3 }
 0x871   :  { %1749 = vrcp.f32 %v830_v4 }
 0x87b   :  { %v1750_v6 = vpop.eup %1749 }
 0x87c   :  { %v833_v7 = vmul.f32 %v1750_v6, %v826_v57 }
 0x87e   :  { %834 = vadd.xlane.f32.xlu1 %v833_v7  ;;  %v837_v8 = vmul.f32 %v833_v7, %v833_v7 }
 0x880   :  { %838 = vadd.xlane.f32.xlu0 %v837_v8 }
 0x90b   :  { %v835_v15 = vpop.xlane.xlu1 %834 }
 0x90c   :  { %v836_v16 = vmul.f32 0.0078125, %v835_v15 }
 0x90d   :  { %v839_v17 = vpop.xlane.xlu0 %838 }
 0x90e   :  { %v841_v18 = vmul.f32 %v836_v16, %v836_v16  ;;  %v840_v19 = vmul.f32 0.0078125, %v839_v17  ;;  %v843_v23 = vsub.f32 %v833_v7, %v836_v16 }
 0x910   :  { %v842_v20 = vsub.f32 %v840_v19, %v841_v18 }
 0x912   :  { %v844_v21 = vadd.f32 0.1, %v842_v20 }
 0x914   :  { %1751 = vrsqrt.f32 %v844_v21 }
 0x91e   :  { %v1752_v24 = vpop.eup %1751 }
 0x91f   :  { %v846_v25 = vmul.f32 %v1752_v24, %v843_v23 }
 0x921   :  { %v851_v27 = vmul.f32 %v850_v22, %v846_v25 }
 0x923   :  { %v856_v28 = vadd.f32 %v855_v26, %v851_v27 }
 0x925   :  { %1554 = vmatmul.mubr.f32.vlgmr.msra.gmra.mrb[4].mxu1 %v856_v28 }
 0x9f8   :  { %v959_v32 = vpop.f32.mrb[4].mxu1 }
 0x9f9   :  { %v960_v33 = vadd.f32 %v959_v32, %v892_v46  ;;  %v1555_v36 = vpop.f32.mrb[5].mxu1 }
 0x9fb   :  { %963 = vst [vmem:[#allocation16] sm:$0xff] %v960_v33 }
 0x9fc   :  { %1918 = shalt.err (!%p1915_p4)
}
 0x9fd   :  { %s1919_s28 = scalar_lea.hbm %s2248_s9, 128 }
 0x9fe   :  { %p1920_p5 = scmp.ne.s32.totalorder %s2248_s9, %s1919_s28  ;;  %p1923_p6 = scmp.lt.u32.totalorder %s1919_s28, %s2248_s9 }
 0xa00   :  { %p1925_p7 = pnand %p1923_p6, %p1920_p5 }
 0xa02   :  { %1928 = shalt.err (!%p1925_p7)
}
 0xa03   :  { %973 = dma.vmem_to_hbm [thread:$0]  %s971_s23, 128, %s2248_s9, [#allocation6]  }
 0xa04   :  { %1937 = dma.done.wait [#allocation6], 128  }
 0xa05   :  { %1938 = vsyncadd [#allocation6], 4294967168 }
 0xa06   :  { %977 = vsyncpa [#allocation5], 1 }
 0xa07   :  { %978 = vsyncpa [#allocation8], 1 }
 0xa08   :  { %979 = vsyncpa [#allocation11], 1 }
 0xa09   :  { %980 = vsyncpa [#allocation14], 1 }
 0xa0a   :  { %981 = vsyncpa [#allocation6], 1 }

</bundles_post_ra>
